<compile_context>
chip_gen: v7x
topology: tpu7x:2x2x1
jax: 0.10.0
libtpu: 0.0.40
codegen_flags: <defaults>
</compile_context>

<pallas_src>
import functools

import jax
import jax.numpy as jnp
from jax import lax
from jax.experimental import pallas as pl
from jax.experimental.pallas import tpu as pltpu


def _binder_reduce_kernel(n_cols, lane_tile, tiles_per_slice,
                          pae_ref, sc_ref, sums_ref, cnts_ref,
                          acc_sc, cnt_sc):
    """Masked per-channel sum + count over one (C, TN) NCHW tile.

    pae_ref : (C, TN)  pae tile in native dtype, channels on sublanes
    sc_ref  : (1, TN)  same_chain tile (int32)
    sums_ref: (C, 1)   per-parallel-slice partial channel sums (f32)
    cnts_ref: (1, 1)   per-parallel-slice partial count (f32)
    acc_sc  : (C, TN)  f32 element-wise running accumulator (VPU only)
    cnt_sc  : (1, TN)  f32 element-wise running mask accumulator
    """
    p = pl.program_id(0)   # parallel slice (v7x: one per TensorCore)
    b = pl.program_id(1)   # batch          (reduction)
    n = pl.program_id(2)   # spatial tile within slice (reduction)

    @pl.when((b == 0) & (n == 0))
    def _():
        acc_sc[...] = jnp.zeros_like(acc_sc)
        cnt_sc[...] = jnp.zeros_like(cnt_sc)

    # True spatial tile index; tail columns and phantom tiles (t*TN >= n_cols)
    # are masked out here, so no divisibility requirements on L.
    t = p * tiles_per_slice + n
    col = t * lane_tile + lax.broadcasted_iota(jnp.int32, (1, lane_tile), 1)
    inter = (sc_ref[...] == 0) & (col < n_cols)            # (1, TN) bool

    x = pae_ref[...].astype(jnp.float32)                   # (C, TN)
    acc_sc[...] += jnp.where(inter, x, 0.0)                # element-wise (VPU)
    cnt_sc[...] += inter.astype(jnp.float32)

    @pl.when((b == pl.num_programs(1) - 1) & (n == pl.num_programs(2) - 1))
    def _():
        # Single cross-lane reduce per parallel slice (epilogue only).
        sums_ref[...] = jnp.sum(acc_sc[...], axis=1, keepdims=True)   # (C, 1)
        cnts_ref[...] = jnp.sum(cnt_sc[...], keepdims=True)           # (1, 1)


def _binder_combine_kernel(sums_ref, cnts_ref, w_ref, b_ref, prob_ref):
    """Combine per-slice partials -> masked mean -> Linear(C->1) -> sigmoid."""
    total = jnp.sum(sums_ref[...], axis=0)                 # (C, 1)
    cnt = jnp.sum(cnts_ref[...])                           # scalar
    safe = jnp.maximum(cnt, 1.0)
    # Empty selection -> torch mean gives NaN -> nan_to_num -> zeros.
    mean = jnp.where(cnt > 0.0, total / safe, jnp.zeros_like(total))  # (C, 1)
    logit = jnp.sum(mean * w_ref[...], keepdims=True) + b_ref[...]    # (1, 1)
    prob_ref[...] = jax.nn.sigmoid(logit)


def binder_network_forward(pae, same_chain, weight, bias, *,
                           lane_tile=8192, num_parallel=2):
    """pae: (B, C, L, L) f32/bf16, same_chain: (B, L, L) int/bool,
    weight: (1, C), bias: (1,)  ->  prob: (1,) f32."""
    B, C, L1, L2 = pae.shape
    assert L1 == L2, "pae must be (B, C, L, L)"
    N = L1 * L2

    # Free reshapes only: pae stays in its native NCHW slab (no transpose, no
    # dtype upcast); same_chain is passed as raw integers (no f32 mask slab).
    pae3 = pae.reshape(B, C, N)
    sc3 = same_chain.astype(jnp.int32).reshape(B, 1, N)

    if N <= lane_tile:
        tn = N                          # whole spatial extent as one block
    else:
        assert lane_tile % 128 == 0, "lane_tile must be a multiple of 128"
        tn = lane_tile
    nt = -(-N // tn)                    # total spatial tiles (ceil)
    P = max(1, min(num_parallel, nt))   # parallel slices (v7x: 2 TensorCores)
    nt_p = -(-nt // P)                  # spatial tiles per slice (ceil)

    def tile_idx(p, n):                 # clamp phantom tiles of the last slice
        return jnp.minimum(p * nt_p + n, nt - 1)

    kernel = functools.partial(_binder_reduce_kernel, N, tn, nt_p)

    part_sums, part_cnts = pl.pallas_call(
        kernel,
        out_shape=(
            jax.ShapeDtypeStruct((P, C, 1), jnp.float32),
            jax.ShapeDtypeStruct((P, 1, 1), jnp.float32),
        ),
        grid_spec=pltpu.PrefetchScalarGridSpec(
            num_scalar_prefetch=0,
            grid=(P, B, nt_p),
            in_specs=[
                pl.BlockSpec((None, C, tn),
                             lambda p, b, n: (b, 0, tile_idx(p, n))),
                pl.BlockSpec((None, 1, tn),
                             lambda p, b, n: (b, 0, tile_idx(p, n))),
            ],
            out_specs=[
                pl.BlockSpec((None, C, 1), lambda p, b, n: (p, 0, 0)),
                pl.BlockSpec((None, 1, 1), lambda p, b, n: (p, 0, 0)),
            ],
            scratch_shapes=[
                pltpu.VMEM((C, tn), jnp.float32),   # element-wise channel sums
                pltpu.VMEM((1, tn), jnp.float32),   # element-wise mask counts
            ],
        ),
        compiler_params=pltpu.CompilerParams(
            dimension_semantics=("parallel", "arbitrary", "arbitrary"),
        ),
    )(pae3, sc3)

    w2 = weight.astype(jnp.float32).reshape(C, 1)
    b2 = bias.astype(jnp.float32).reshape(1, 1)
    prob = pl.pallas_call(
        _binder_combine_kernel,
        out_shape=jax.ShapeDtypeStruct((1, 1), jnp.float32),
    )(part_sums, part_cnts, w2, b2)

    return prob.reshape(1)              # matches torch output shape (1,)


# Jitted entry point: static tiling knobs, cached compilation across calls
# with identical shapes/dtypes.
binder_fwd = jax.jit(binder_network_forward,
                     static_argnames=("lane_tile", "num_parallel"))


def _reference_forward(pae, same_chain, weight, bias):
    """Pure-JAX reference mirroring the torch code (f32 math)."""
    logits = jnp.transpose(pae.astype(jnp.float32), (0, 2, 3, 1))   # (B,L,L,C)
    mask = (same_chain == 0)[..., None].astype(jnp.float32)
    cnt = jnp.sum(mask)
    s = jnp.sum(logits * mask, axis=(0, 1, 2))
    mean = jnp.where(cnt > 0, s / jnp.maximum(cnt, 1.0), jnp.zeros_like(s))
    logit = mean @ weight.astype(jnp.float32).reshape(-1) + bias.astype(jnp.float32)[0]
    return jax.nn.sigmoid(logit).reshape(1)


if __name__ == "__main__":
    key = jax.random.PRNGKey(0)
    C = 64                                      # n_bin_pae (module default)

    # --- case 1: module defaults (zero-init Linear), B=2, L=16 --------------
    k1, k2, k3, k4 = jax.random.split(key, 4)
    B, L = 2, 16
    pae = jax.random.normal(k1, (B, C, L, L), dtype=jnp.float32)
    same_chain = (jax.random.uniform(k2, (B, L, L)) > 0.5).astype(jnp.int32)
    w0 = jnp.zeros((1, C), dtype=jnp.float32)   # reset_parameter(): zeros
    b0 = jnp.zeros((1,), dtype=jnp.float32)
    out = jax.block_until_ready(binder_fwd(pae, same_chain, w0, b0))
    ref = _reference_forward(pae, same_chain, w0, b0)
    assert out.shape == (1,)
    assert jnp.allclose(out, ref, atol=1e-5), (out, ref)

    # --- case 2: random Linear params, same inputs (reuses compiled kernel) --
    w1 = jax.random.normal(k3, (1, C), dtype=jnp.float32) * 0.1
    b1 = jax.random.normal(k4, (1,), dtype=jnp.float32) * 0.1
    out = jax.block_until_ready(binder_fwd(pae, same_chain, w1, b1))
    ref = _reference_forward(pae, same_chain, w1, b1)
    assert jnp.allclose(out, ref, atol=1e-5), (out, ref)

    # --- case 3: ragged spatial size, forced multi-tile + 2 parallel slices --
    k5, k6 = jax.random.split(k1)
    Bc, Lc = 1, 24                              # N = 576 (tail tile + phantom)
    pae_c = jax.random.normal(k5, (Bc, C, Lc, Lc), dtype=jnp.float32)
    sc_c = (jax.random.uniform(k6, (Bc, Lc, Lc)) > 0.3).astype(jnp.int32)
    out = jax.block_until_ready(
        binder_fwd(pae_c, sc_c, w1, b1, lane_tile=128, num_parallel=2))
    ref = _reference_forward(pae_c, sc_c, w1, b1)
    assert jnp.allclose(out, ref, atol=1e-5), (out, ref)

    # --- case 4: bf16 pae stays bf16 in HBM (cast happens in-kernel) --------
    pae_bf16 = pae.astype(jnp.bfloat16)
    out = jax.block_until_ready(binder_fwd(pae_bf16, same_chain, w1, b1))
    ref = _reference_forward(pae_bf16, same_chain, w1, b1)
    assert jnp.allclose(out, ref, atol=1e-5), (out, ref)

    print("KERNEL_OK")
</pallas_src>

<mosaic_0001>
module attributes {stable_mosaic.version = 11 : i64} {
  func.func @_binder_reduce_kernel(%arg0: i32, %arg1: i32, %arg2: i32, %arg3: memref<1x64x256xf32, #tpu.memory_space<vmem>>, %arg4: memref<1x1x256xi32, #tpu.memory_space<vmem>>, %arg5: memref<1x64x1xf32, #tpu.memory_space<vmem>>, %arg6: memref<1x1x1xf32, #tpu.memory_space<vmem>>, %arg7: memref<64x256xf32, #tpu.memory_space<vmem>>, %arg8: memref<1x256xf32, #tpu.memory_space<vmem>>) attributes {dimension_semantics = [#tpu.dimension_semantics<parallel>, #tpu.dimension_semantics<arbitrary>, #tpu.dimension_semantics<arbitrary>], iteration_bounds = array<i64: 1, 2, 1>, scalar_prefetch = 0 : i64, scratch_operands = 2 : i64, tpu.core_type = #tpu.core_type<tc>, window_params = [{transform_indices = @transform_0, window_bounds = array<i64: 1, 64, 256>}, {transform_indices = @transform_1, window_bounds = array<i64: 1, 1, 256>}, {transform_indices = @transform_2, window_bounds = array<i64: 1, 64, 1>}, {transform_indices = @transform_3, window_bounds = array<i64: 1, 1, 1>}]} {
    %c0_i32 = arith.constant 0 : i32
    %0 = arith.cmpi eq, %arg1, %c0_i32 : i32
    %c0_i32_0 = arith.constant 0 : i32
    %1 = arith.cmpi eq, %arg2, %c0_i32_0 : i32
    %2 = arith.andi %0, %1 : i1
    %3 = arith.extui %2 : i1 to i32
    %c0_i32_1 = arith.constant 0 : i32
    %4 = arith.cmpi ne, %3, %c0_i32_1 : i32
    scf.if %4 {
      %cst_20 = arith.constant 0.000000e+00 : f32
      %37 = vector.broadcast %cst_20 : f32 to vector<64x256xf32>
      %c0_21 = arith.constant 0 : index
      %c0_22 = arith.constant 0 : index
      %38 = vector.load %arg7[%c0_21, %c0_22] : memref<64x256xf32, #tpu.memory_space<vmem>>, vector<64x256xf32>
      tpu.vector_store %arg7[%c0_21, %c0_22], %37 {strides = array<i32>} : memref<64x256xf32, #tpu.memory_space<vmem>>, vector<64x256xf32>,
      %cst_23 = arith.constant 0.000000e+00 : f32
      %39 = vector.broadcast %cst_23 : f32 to vector<1x256xf32>
      %c0_24 = arith.constant 0 : index
      %c0_25 = arith.constant 0 : index
      %40 = vector.load %arg8[%c0_24, %c0_25] : memref<1x256xf32, #tpu.memory_space<vmem>>, vector<1x256xf32>
      tpu.vector_store %arg8[%c0_24, %c0_25], %39 {strides = array<i32>} : memref<1x256xf32, #tpu.memory_space<vmem>>, vector<1x256xf32>,
    } else {
    }
    %c1_i32 = arith.constant 1 : i32
    %5 = arith.muli %arg0, %c1_i32 : i32
    %6 = arith.addi %5, %arg2 : i32
    %c256_i32 = arith.constant 256 : i32
    %7 = arith.muli %6, %c256_i32 : i32
    %8 = tpu.iota {dimensions = array<i32: 1>} : vector<1x256xi32>
    %9 = vector.broadcast %7 : i32 to vector<1x256xi32>
    %10 = arith.addi %9, %8 : vector<1x256xi32>
    %c0 = arith.constant 0 : index
    %c0_2 = arith.constant 0 : index
    %c0_3 = arith.constant 0 : index
    %11 = vector.load %arg4[%c0, %c0_2, %c0_3] : memref<1x1x256xi32, #tpu.memory_space<vmem>>, vector<1x1x256xi32>
    %12 = vector.shape_cast %11 : vector<1x1x256xi32> to vector<1x256xi32>
    %c0_i32_4 = arith.constant 0 : i32
    %13 = vector.broadcast %c0_i32_4 : i32 to vector<1x256xi32>
    %14 = arith.cmpi eq, %12, %13 : vector<1x256xi32>
    %c256_i32_5 = arith.constant 256 : i32
    %15 = vector.broadcast %c256_i32_5 : i32 to vector<1x256xi32>
    %16 = arith.cmpi slt, %10, %15 : vector<1x256xi32>
    %17 = arith.andi %14, %16 : vector<1x256xi1>
    %c0_6 = arith.constant 0 : index
    %c0_7 = arith.constant 0 : index
    %c0_8 = arith.constant 0 : index
    %18 = vector.load %arg3[%c0_6, %c0_7, %c0_8] : memref<1x64x256xf32, #tpu.memory_space<vmem>>, vector<1x64x256xf32>
    %19 = vector.shape_cast %18 : vector<1x64x256xf32> to vector<64x256xf32>
    %c0_9 = arith.constant 0 : index
    %c0_10 = arith.constant 0 : index
    %20 = vector.load %arg7[%c0_9, %c0_10] : memref<64x256xf32, #tpu.memory_space<vmem>>, vector<64x256xf32>
    %cst = arith.constant 0.000000e+00 : f32
    %21 = vector.shape_cast %17 : vector<1x256xi1> to vector<1x256xi1>
    %22 = vector.broadcast %21 : vector<1x256xi1> to vector<64x256xi1>
    %23 = vector.broadcast %cst : f32 to vector<64x256xf32>
    %24 = arith.select %22, %19, %23 : vector<64x256xi1>, vector<64x256xf32>
    %25 = arith.addf %20, %24 : vector<64x256xf32>
    %c0_11 = arith.constant 0 : index
    %c0_12 = arith.constant 0 : index
    %26 = vector.load %arg7[%c0_11, %c0_12] : memref<64x256xf32, #tpu.memory_space<vmem>>, vector<64x256xf32>
    tpu.vector_store %arg7[%c0_11, %c0_12], %25 {strides = array<i32>} : memref<64x256xf32, #tpu.memory_space<vmem>>, vector<64x256xf32>,
    %c0_13 = arith.constant 0 : index
    %c0_14 = arith.constant 0 : index
    %27 = vector.load %arg8[%c0_13, %c0_14] : memref<1x256xf32, #tpu.memory_space<vmem>>, vector<1x256xf32>
    %28 = arith.extui %17 : vector<1x256xi1> to vector<1x256xi32>
    %29 = arith.sitofp %28 : vector<1x256xi32> to vector<1x256xf32>
    %30 = arith.addf %27, %29 : vector<1x256xf32>
    %c0_15 = arith.constant 0 : index
    %c0_16 = arith.constant 0 : index
    %31 = vector.load %arg8[%c0_15, %c0_16] : memref<1x256xf32, #tpu.memory_space<vmem>>, vector<1x256xf32>
    tpu.vector_store %arg8[%c0_15, %c0_16], %30 {strides = array<i32>} : memref<1x256xf32, #tpu.memory_space<vmem>>, vector<1x256xf32>,
    %c1_i32_17 = arith.constant 1 : i32
    %32 = arith.cmpi eq, %arg1, %c1_i32_17 : i32
    %c0_i32_18 = arith.constant 0 : i32
    %33 = arith.cmpi eq, %arg2, %c0_i32_18 : i32
    %34 = arith.andi %32, %33 : i1
    %35 = arith.extui %34 : i1 to i32
    %c0_i32_19 = arith.constant 0 : i32
    %36 = arith.cmpi ne, %35, %c0_i32_19 : i32
    scf.if %36 {
      %c0_20 = arith.constant 0 : index
      %c0_21 = arith.constant 0 : index
      %37 = vector.load %arg7[%c0_20, %c0_21] : memref<64x256xf32, #tpu.memory_space<vmem>>, vector<64x256xf32>
      %cst_22 = arith.constant dense<0.000000e+00> : vector<64xf32>
      %38 = vector.multi_reduction <add>, %37, %cst_22 [1] : vector<64x256xf32> to vector<64xf32>
      %39 = vector.shape_cast %38 : vector<64xf32> to vector<64x1xf32>
      %c0_23 = arith.constant 0 : index
      %c0_24 = arith.constant 0 : index
      %c0_25 = arith.constant 0 : index
      %40 = vector.load %arg5[%c0_23, %c0_24, %c0_25] : memref<1x64x1xf32, #tpu.memory_space<vmem>>, vector<1x64x1xf32>
      %41 = vector.shape_cast %40 : vector<1x64x1xf32> to vector<64x1xf32>
      %42 = vector.shape_cast %39 : vector<64x1xf32> to vector<1x64x1xf32>
      tpu.vector_store %arg5[%c0_23, %c0_24, %c0_25], %42 {strides = array<i32>} : memref<1x64x1xf32, #tpu.memory_space<vmem>>, vector<1x64x1xf32>,
      %c0_26 = arith.constant 0 : index
      %c0_27 = arith.constant 0 : index
      %43 = vector.load %arg8[%c0_26, %c0_27] : memref<1x256xf32, #tpu.memory_space<vmem>>, vector<1x256xf32>
      %44 = vector.shape_cast %43 : vector<1x256xf32> to vector<1x1x256xf32>
      %cst_28 = arith.constant dense<0.000000e+00> : vector<1xf32>
      %45 = vector.multi_reduction <add>, %44, %cst_28 [1, 2] : vector<1x1x256xf32> to vector<1xf32>
      %46 = vector.shape_cast %45 : vector<1xf32> to vector<1x1x1xf32>
      %47 = vector.extract %46[0, 0, 0] : f32 from vector<1x1x1xf32>
      %48 = vector.broadcast %47 : f32 to vector<1x1xf32>
      %c0_29 = arith.constant 0 : index
      %c0_30 = arith.constant 0 : index
      %c0_31 = arith.constant 0 : index
      %49 = vector.load %arg6[%c0_29, %c0_30, %c0_31] : memref<1x1x1xf32, #tpu.memory_space<vmem>>, vector<1x1x1xf32>
      %50 = vector.shape_cast %49 : vector<1x1x1xf32> to vector<1x1xf32>
      %51 = vector.shape_cast %48 : vector<1x1xf32> to vector<1x1x1xf32>
      tpu.vector_store %arg6[%c0_29, %c0_30, %c0_31], %51 {strides = array<i32>} : memref<1x1x1xf32, #tpu.memory_space<vmem>>, vector<1x1x1xf32>,
    } else {
    }
    return
  }
  func.func @transform_0(%arg0: i32, %arg1: i32, %arg2: i32) -> (i32, i32, i32) {
    %c1_i32 = arith.constant 1 : i32
    %0 = arith.muli %arg0, %c1_i32 : i32
    %1 = arith.addi %0, %arg2 : i32
    %c0_i32 = arith.constant 0 : i32
    %2 = arith.minsi %1, %c0_i32 : i32
    %c0_i32_0 = arith.constant 0 : i32
    %c0_i32_1 = arith.constant 0 : i32
    return %arg1, %c0_i32_0, %2 : i32, i32, i32
  }
  func.func @transform_1(%arg0: i32, %arg1: i32, %arg2: i32) -> (i32, i32, i32) {
    %c1_i32 = arith.constant 1 : i32
    %0 = arith.muli %arg0, %c1_i32 : i32
    %1 = arith.addi %0, %arg2 : i32
    %c0_i32 = arith.constant 0 : i32
    %2 = arith.minsi %1, %c0_i32 : i32
    %c0_i32_0 = arith.constant 0 : i32
    %c0_i32_1 = arith.constant 0 : i32
    return %arg1, %c0_i32_0, %2 : i32, i32, i32
  }
  func.func @transform_2(%arg0: i32, %arg1: i32, %arg2: i32) -> (i32, i32, i32) {
    %c0_i32 = arith.constant 0 : i32
    %c0_i32_0 = arith.constant 0 : i32
    %c0_i32_1 = arith.constant 0 : i32
    return %arg0, %c0_i32, %c0_i32_0 : i32, i32, i32
  }
  func.func @transform_3(%arg0: i32, %arg1: i32, %arg2: i32) -> (i32, i32, i32) {
    %c0_i32 = arith.constant 0 : i32
    %c0_i32_0 = arith.constant 0 : i32
    %c0_i32_1 = arith.constant 0 : i32
    return %arg0, %c0_i32, %c0_i32_0 : i32, i32, i32
  }
}

module attributes {stable_mosaic.version = 11 : i64} {
  func.func @_binder_combine_kernel(%arg0: memref<1x64x1xf32, #tpu.memory_space<vmem>>, %arg1: memref<1x1x1xf32, #tpu.memory_space<vmem>>, %arg2: memref<64x1xf32, #tpu.memory_space<vmem>>, %arg3: memref<1x1xf32, #tpu.memory_space<vmem>>, %arg4: memref<1x1xf32, #tpu.memory_space<vmem>>) attributes {dimension_semantics = [], scalar_prefetch = 0 : i64, scratch_operands = 0 : i64, tpu.core_type = #tpu.core_type<tc>} {
    %c0 = arith.constant 0 : index
    %c0_0 = arith.constant 0 : index
    %c0_1 = arith.constant 0 : index
    %0 = vector.load %arg0[%c0, %c0_0, %c0_1] : memref<1x64x1xf32, #tpu.memory_space<vmem>>, vector<1x64x1xf32>
    %cst = arith.constant dense<0.000000e+00> : vector<64x1xf32>
    %1 = vector.multi_reduction <add>, %0, %cst [0] : vector<1x64x1xf32> to vector<64x1xf32>
    %c0_2 = arith.constant 0 : index
    %c0_3 = arith.constant 0 : index
    %c0_4 = arith.constant 0 : index
    %2 = vector.load %arg1[%c0_2, %c0_3, %c0_4] : memref<1x1x1xf32, #tpu.memory_space<vmem>>, vector<1x1x1xf32>
    %3 = vector.shape_cast %2 : vector<1x1x1xf32> to vector<1x1x1x1xf32>
    %cst_5 = arith.constant dense<0.000000e+00> : vector<1xf32>
    %4 = vector.multi_reduction <add>, %3, %cst_5 [1, 2, 3] : vector<1x1x1x1xf32> to vector<1xf32>
    %5 = vector.shape_cast %4 : vector<1xf32> to vector<1x1x1x1xf32>
    %6 = vector.extract %5[0, 0, 0, 0] : f32 from vector<1x1x1x1xf32>
    %cst_6 = arith.constant 1.000000e+00 : f32
    %7 = arith.maximumf %6, %cst_6 : f32
    %cst_7 = arith.constant 0.000000e+00 : f32
    %8 = arith.cmpf ogt, %6, %cst_7 : f32
    %9 = vector.broadcast %7 : f32 to vector<64x1xf32>
    %10 = arith.divf %1, %9 : vector<64x1xf32>
    %cst_8 = arith.constant 0.000000e+00 : f32
    %11 = vector.broadcast %cst_8 : f32 to vector<64x1xf32>
    %12 = arith.select %8, %10, %11 : vector<64x1xf32>
    %c0_9 = arith.constant 0 : index
    %c0_10 = arith.constant 0 : index
    %13 = vector.load %arg2[%c0_9, %c0_10] : memref<64x1xf32, #tpu.memory_space<vmem>>, vector<64x1xf32>
    %14 = arith.mulf %12, %13 : vector<64x1xf32>
    %15 = vector.shape_cast %14 : vector<64x1xf32> to vector<1x64x1xf32>
    %cst_11 = arith.constant dense<0.000000e+00> : vector<1xf32>
    %16 = vector.multi_reduction <add>, %15, %cst_11 [1, 2] : vector<1x64x1xf32> to vector<1xf32>
    %17 = vector.shape_cast %16 : vector<1xf32> to vector<1x1x1xf32>
    %18 = vector.extract %17[0, 0, 0] : f32 from vector<1x1x1xf32>
    %19 = vector.broadcast %18 : f32 to vector<1x1xf32>
    %c0_12 = arith.constant 0 : index
    %c0_13 = arith.constant 0 : index
    %20 = vector.load %arg3[%c0_12, %c0_13] : memref<1x1xf32, #tpu.memory_space<vmem>>, vector<1x1xf32>
    %21 = arith.addf %19, %20 : vector<1x1xf32>
    %22 = arith.negf %21 : vector<1x1xf32>
    %23 = math.exp %22 : vector<1x1xf32>
    %cst_14 = arith.constant 1.000000e+00 : f32
    %24 = vector.broadcast %cst_14 : f32 to vector<1x1xf32>
    %25 = arith.addf %24, %23 : vector<1x1xf32>
    %26 = arith.divf %24, %25 : vector<1x1xf32>
    %c0_15 = arith.constant 0 : index
    %c0_16 = arith.constant 0 : index
    %27 = vector.load %arg4[%c0_15, %c0_16] : memref<1x1xf32, #tpu.memory_space<vmem>>, vector<1x1xf32>
    tpu.vector_store %arg4[%c0_15, %c0_16], %26 {strides = array<i32>} : memref<1x1xf32, #tpu.memory_space<vmem>>, vector<1x1xf32>,
    return
  }
}

</mosaic_0001>

<bundles_post_ra>
// kernel: binder_network_forward.3
= control target key start
LH: loop header
LB: loop body
LE: loop exit
PB: predicated region body
PF: predicated region fallthrough
CT: control target
= control target key end

     0   :  { %s288_s0 = inlined_call_operand.vmem [shape: f32[1,64,1], index: 0, kind: input, shape index: {}]   ;;  %s289_s1 = inlined_call_operand.<no memory space> [shape: f32[1,1,1], index: 1, kind: input, shape index: {}]   ;;  %s290_s2 = inlined_call_operand.vmem [shape: f32[64,1], index: 2, kind: input, shape index: {}]   ;;  %s291_s4 = inlined_call_operand.hbm [shape: f32[1,1], index: 4, kind: output, shape index: {}]   ;;  %s292_s3 = inlined_call_operand.<no memory space> [shape: f32[1,1], index: 3, kind: input, shape index: {}]  }
   0x1   :  { %v9_v0 = vstv %s289_s1  ;;  %v11_v1 = vstv %s292_s3 }
   0x2   :  { %10 = vst [vmem:[#allocation2] sm:$0x1] %v9_v0  ;;  %12 = vst [vmem:[#allocation3] sm:$0x1] %v11_v1 }
   0x9   :  { %v38_v2 = vld [vmem:[#allocation2] sm:$0x1] }
   0xa   :  { %131 = vpush %v38_v2 }
   0xb   :  { %13 = vsyncpa [#allocation5], 0  ;;  %s167_s20 = smov 1.0   ;;  %v22_v4 = vld [vmem:[%s288_s0] sm:$0xff]  ;;  %v23_v5 = vld [vmem:[%s288_s0 + $0x8] sm:$0xff]  ;;  %vm80_vm1 = vcmask 7168  }
   0xc   :  { %v24_v6 = vld [vmem:[%s288_s0 + $0x10] sm:$0xff]  ;;  %v25_v7 = vld [vmem:[%s288_s0 + $0x18] sm:$0xff]  ;;  %v26_v9 = vld [vmem:[%s288_s0 + $0x20] sm:$0xff]  ;;  %s168_s25 = smov [#allocation4]   ;;  %vm114_vm2 = vcmask 0  }
   0xd   :  { %v27_v11 = vld [vmem:[%s288_s0 + $0x28] sm:$0xff]  ;;  %v64_v18 = vld [vmem:[%s290_s2] sm:$0xff]  ;;  %v66_v20 = vld [vmem:[%s290_s2 + $0x10] sm:$0xff]  ;;  %s122_s3 = sshll.u32 %s168_s25, 4  ;;  %s123_s3 = int_to_ptr.vmem [resolvable:$true] %s122_s3 }
   0xe   :  { %v65_v19 = vld [vmem:[%s290_s2 + $0x8] sm:$0xff]  ;;  %v28_v21 = vld [vmem:[%s288_s0 + $0x30] sm:$0xff]  ;;  %v67_v27 = vld [vmem:[%s290_s2 + $0x18] sm:$0xff]  ;;  %s143_s26 = scalar_lea.vmem %s123_s3, 16  ;;  %s147_s27 = scalar_lea.vmem %s123_s3, 32 }
   0xf   :  { %v29_v28 = vld [vmem:[%s288_s0 + $0x38] sm:$0xff]  ;;  %v68_v34 = vld [vmem:[%s290_s2 + $0x20] sm:$0xff]  ;;  %v69_v40 = vld [vmem:[%s290_s2 + $0x28] sm:$0xff]  ;;  %p144_p1 = scmp.ne.s32.totalorder %s123_s3, %s143_s26  ;;  %p148_p2 = scmp.lt.s32.totalorder %s123_s3, %s123_s3 }
  0x10   :  { %v70_v45 = vld [vmem:[%s290_s2 + $0x30] sm:$0xff]  ;;  %v71_v50 = vld [vmem:[%s290_s2 + $0x38] sm:$0xff]  ;;  %p149_p3 = scmp.lt.s32.totalorder %s147_s27, %s143_s26 }
  0x12   :  { %p150_p4 = por %p149_p3, %p148_p2 }
  0x14   :  { %p151_p5 = pnand %p150_p4, %p144_p1 }
  0x3b   :  { %s132_s19 = spop %131 }
  0x3c   :  { %s41_s21 = smax.f32 %s167_s20, %s132_s19  ;;  %p42_p0 = scmp.gt.f32.partialorder %s132_s19, 0.0 }
  0x3d   :  { %v43_v3 = vstv %s41_s21 }
  0x3e   :  { %137 = vrcp.f32 %v43_v3  ;;  %s53_s22 = scalar_select %p42_p0, 1, 0 }
  0x40   :  { %v54_v8 = vstv %s53_s22 }
  0x41   :  { %vm218_vm0 = vcmp.eq.s32.totalorder %v54_v8, 1 }
  0x48   :  { %v138_v10 = vpop.eup %137 }
  0x49   :  { %v45_v12 = vmul.f32 %v138_v10, %v22_v4  ;;  %v46_v13 = vmul.f32 %v138_v10, %v23_v5  ;;  %v47_v14 = vmul.f32 %v138_v10, %v24_v6  ;;  %v48_v15 = vmul.f32 %v138_v10, %v25_v7  ;;  %v106_v5 = vld [vmem:[#allocation3] sm:$0x1] }
  0x4a   :  { %v49_v17 = vmul.f32 %v138_v10, %v26_v9  ;;  %v50_v25 = vmul.f32 %v138_v10, %v27_v11  ;;  %v51_v32 = vmul.f32 %v138_v10, %v28_v21  ;;  %v52_v38 = vmul.f32 %v138_v10, %v29_v28 }
  0x4b   :  { %v56_v22 = vsel %vm218_vm0, %v45_v12, 0.0  ;;  %v57_v23 = vsel %vm218_vm0, %v46_v13, 0.0  ;;  %v58_v24 = vsel %vm218_vm0, %v47_v14, 0.0  ;;  %v59_v26 = vsel %vm218_vm0, %v48_v15, 0.0 }
  0x4c   :  { %v72_v29 = vmul.f32 %v64_v18, %v56_v22  ;;  %v73_v30 = vmul.f32 %v65_v19, %v57_v23  ;;  %v74_v31 = vmul.f32 %v66_v20, %v58_v24  ;;  %v60_v33 = vsel %vm218_vm0, %v49_v17, 0.0 }
  0x4d   :  { %v75_v35 = vmul.f32 %v67_v27, %v59_v26  ;;  %v61_v39 = vsel %vm218_vm0, %v50_v25, 0.0  ;;  %v76_v42 = vmul.f32 %v68_v34, %v60_v33  ;;  %v62_v44 = vsel %vm218_vm0, %v51_v32, 0.0 }
  0x4e   :  { %v81_v36 = vsel %vm80_vm1, %v72_v29, 0.0  ;;  %v82_v37 = vsel %vm80_vm1, %v73_v30, 0.0  ;;  %v84_v43 = vsel %vm80_vm1, %v74_v31, 0.0  ;;  %v77_v47 = vmul.f32 %v69_v40, %v61_v39 }
  0x4f   :  { %v83_v41 = vadd.f32 %v82_v37, %v81_v36  ;;  %v86_v48 = vsel %vm80_vm1, %v75_v35, 0.0  ;;  %v63_v49 = vsel %vm218_vm0, %v52_v38, 0.0  ;;  %v78_v52 = vmul.f32 %v70_v45, %v62_v44 }
  0x50   :  { %v88_v53 = vsel %vm80_vm1, %v76_v42, 0.0  ;;  %v79_v55 = vmul.f32 %v71_v50, %v63_v49  ;;  %v90_v56 = vsel %vm80_vm1, %v77_v47, 0.0 }
  0x51   :  { %v85_v46 = vadd.f32 %v84_v43, %v83_v41  ;;  %v92_v58 = vsel %vm80_vm1, %v78_v52, 0.0 }
  0x52   :  { %v94_v60 = vsel %vm80_vm1, %v79_v55, 0.0 }
  0x53   :  { %v87_v51 = vadd.f32 %v86_v48, %v85_v46 }
  0x55   :  { %v89_v54 = vadd.f32 %v88_v53, %v87_v51 }
  0x57   :  { %v91_v57 = vadd.f32 %v90_v56, %v89_v54 }
  0x59   :  { %v93_v59 = vadd.f32 %v92_v58, %v91_v57 }
  0x5b   :  { %v95_v61 = vadd.f32 %v94_v60, %v93_v59 }
  0x5d   :  { %96 = vadd.xlane.f32.xlu0 %v95_v61 }
  0xea   :  { %v97_v62 = vpop.xlane.xlu0 %96 }
  0xeb   :  { %v98_v63 = vrot.slane %v97_v62, 4 }
  0xed   :  { %v99_v0 = vadd.f32 %v98_v63, %v97_v62 }
  0xef   :  { %v100_v1 = vrot.slane %v99_v0, 2 }
  0xf1   :  { %v101_v2 = vadd.f32 %v100_v1, %v99_v0 }
  0xf3   :  { %v102_v3 = vrot.slane %v101_v2, 1 }
  0xf5   :  { %v103_v4 = vadd.f32 %v102_v3, %v101_v2 }
  0xf7   :  { %133 = vpush %v103_v4 }
 0x128   :  { %s134_s2 = spop %133 }
 0x129   :  { %v105_v6 = vstv %s134_s2 }
 0x12a   :  { %v107_v7 = vadd.f32 %v106_v5, %v105_v6 }
 0x12c   :  { %v130_v8 = vmul.f32 -1.442695, %v107_v7 }
 0x12e   :  { %139 = vpow2.f32 %v130_v8 }
 0x138   :  { %v140_v9 = vpop.eup %139 }
 0x139   :  { %v111_v10 = vadd.f32 1.0, %v140_v9 }
 0x13b   :  { %141 = vrcp.f32 %v111_v10 }
 0x145   :  { %v142_v11 = vpop.eup %141 }
 0x146   :  { %115 = vst.msk [vmem:[#allocation4] sm:$0x1] %vm114_vm2, %v142_v11 }
 0x147   :  { %154 = shalt.err (!%p151_p5)
}
 0x148   :  { %s155_s30 = scalar_lea.hbm %s291_s4, 16 }
 0x149   :  { %p156_p6 = scmp.ne.s32.totalorder %s291_s4, %s155_s30  ;;  %p159_p7 = scmp.lt.u32.totalorder %s155_s30, %s291_s4 }
 0x14b   :  { %p161_p8 = pnand %p159_p7, %p156_p6 }
 0x14d   :  { %164 = shalt.err (!%p161_p8)
}
 0x14e   :  { %125 = dma.vmem_to_hbm [thread:$0]  %s123_s3, 16, %s291_s4, [#allocation5]  }
 0x14f   :  { %165 = dma.done.wait [#allocation5], 16  }
 0x150   :  { %166 = vsyncadd [#allocation5], 4294967280 }
 0x151   :  { %129 = vsyncpa [#allocation5], 1 }

// kernel: binder_network_forward.2
= control target key start
LH: loop header
LB: loop body
LE: loop exit
PB: predicated region body
PF: predicated region fallthrough
CT: control target
= control target key end

     0   :  { %9 = vsyncpa [#allocation5], 0  ;;  %s773_s12 = smov 0   ;;  %s775_s13 = smov 0   ;;  %s953_s0 = inlined_call_operand.vmem [shape: f32[2,64,256], index: 0, kind: input, shape index: {}]   ;;  %s954_s1 = inlined_call_operand.vmem [shape: s32[2,1,256], index: 1, kind: input, shape index: {}]   ;;  %s955_s2 = inlined_call_operand.vmem [shape: f32[1,64,1], index: 2, kind: output, shape index: {0}]   ;;  %s956_s3 = inlined_call_operand.hbm [shape: f32[1,1,1], index: 3, kind: output, shape index: {1}]  }
   0x1   :  { %s777_s14 = smov 0  }
   0x2 LB: > { %s637_s15 = sadd.s32 4294967295, %s745_s14   ;;  %s30_s16 = sadd.s32 1, %s741_s13  ;;  %s745_s14 = sphi %s777_s14, %s15_s14   ;;  %s741_s13 = sphi %s775_s13, %s961_s13   ;;  %s737_s12 = sphi %s773_s12, %s960_s12  }
   0x3   : > { %p32_p0 = scmp.ge.s32.totalorder %s30_s16, 2  ;;  %p640_p1 = scmp.ge.s32.totalorder %s745_s14, 1 }
   0x4   : > { %p207_p2 = scmp.lt.s32.totalorder %s745_s14, 3 }
   0x5   : > { %s963_s16 = smov (%p32_p0, %s30_s16), 0 }
   0x6   : > { %p208_p3 = pnand %p640_p1, %p207_p2 }
   0x7   : > { %p253_p4 = scmp.lt.s32.totalorder (!%p208_p3), %s737_s12, 1  ;;  %p285_p5 = scmp.eq.s32.totalorder (!%p208_p3), %s737_s12, 0 }
   0x8   : > { %211 = sbr.rel (%p208_p3) target bundleno = 287 (0x11f), region = 28 }
   0xf   : > { %s254_s17 = scalar_select %p253_p4, %s737_s12, 1 }
  0x10   : > { %290 = sbr.rel (!%p285_p5) target bundleno = 26 (0x1a), region = 32  ;;  %v307_v0 = vlaneseq (%p285_p5)  ;;  %v747_v1 = vmov (%p285_p5), 0.0  }
  0x11   : > { %s652_s18 = sshll.u32 %s254_s17, 7  ;;  %s643_s19 = sshll.u32 %s254_s17, 1  ;;  %291 = vst [vmem:[#allocation2] sm:$0xff] (%p285_p5), %v747_v1  ;;  %292 = vst [vmem:[#allocation2 + $0x8] sm:$0xff] (%p285_p5), %v747_v1 }
  0x12   : > { %s800_s22 = scalar_lea.vmem %s953_s0, %s652_s18  ;;  %s805_s25 = scalar_lea.vmem %s954_s1, %s643_s19  ;;  %293 = vst [vmem:[#allocation2 + $0x10] sm:$0xff] (%p285_p5), %v747_v1  ;;  %294 = vst [vmem:[#allocation2 + $0x18] sm:$0xff] (%p285_p5), %v747_v1  ;;  %vm309_vm0 = vcmp.lt.s32.totalorder (%p285_p5), %v307_v0, 256 }
  0x13   : > { %295 = vst [vmem:[#allocation2 + $0x20] sm:$0xff] (%p285_p5), %v747_v1  ;;  %296 = vst [vmem:[#allocation2 + $0x28] sm:$0xff] (%p285_p5), %v747_v1 }
  0x14   : > { %297 = vst [vmem:[#allocation2 + $0x30] sm:$0xff] (%p285_p5), %v747_v1  ;;  %298 = vst [vmem:[#allocation2 + $0x38] sm:$0xff] (%p285_p5), %v747_v1 }
  0x15   : > { %299 = vst [vmem:[#allocation2 + $0x40] sm:$0xff] (%p285_p5), %v747_v1  ;;  %300 = vst [vmem:[#allocation2 + $0x48] sm:$0xff] (%p285_p5), %v747_v1 }
  0x16   : > { %301 = vst [vmem:[#allocation2 + $0x50] sm:$0xff] (%p285_p5), %v747_v1  ;;  %302 = vst [vmem:[#allocation2 + $0x58] sm:$0xff] (%p285_p5), %v747_v1 }
  0x17   : > { %303 = vst [vmem:[#allocation2 + $0x60] sm:$0xff] %v747_v1  ;;  %304 = vst [vmem:[#allocation2 + $0x68] sm:$0xff] %v747_v1 }
  0x18   : > { %305 = vst [vmem:[#allocation2 + $0x70] sm:$0xff] %v747_v1  ;;  %306 = vst [vmem:[#allocation2 + $0x78] sm:$0xff] %v747_v1 }
  0x19   : > { %311 = vst.msk [vmem:[#allocation3] sm:$0x3] %vm309_vm0, %v747_v1 }
  0x1a PF: > { %v330_v2 = vlaneseq  ;;  %v748_v3 = vmov 1966171168   ;;  %p442_p6 = scmp.eq.s32.totalorder %s737_s12, 1  ;;  %v749_v6 = vmov 1   ;;  %v320_v10 = vld [vmem:[%s805_s25] sm:$0x3] }
  0x1b   : > { %v328_v4 = vunpack.c.l.s4 %v748_v3  ;;  %v326_v7 = vcombine.low %v749_v6, %v749_v6  ;;  %vm321_vm1 = vcmp.eq.s32.totalorder %v320_v10, 0  ;;  %v343_v16 = vld [vmem:[%s800_s22] sm:$0xff]  ;;  %v344_v17 = vld [vmem:[%s800_s22 + $0x8] sm:$0xff]  ;;  %v750_v19 = vmov 0   ;;  %v345_v22 = vld [vmem:[%s800_s22 + $0x10] sm:$0xff] }
  0x1c   : > { %v808_v5 = vshrl.u32 %v330_v2, 7  ;;  %v359_v18 = vld [vmem:[#allocation2] sm:$0xff]  ;;  %v360_v21 = vld [vmem:[#allocation2 + $0x8] sm:$0xff]  ;;  %v361_v23 = vld [vmem:[#allocation2 + $0x10] sm:$0xff]  ;;  %v751_v25 = vmov 0.0   ;;  %vm818_vm4 = vcmp.lt.s32.totalorder %v330_v2, 256 }
  0x1d   : > { %v329_v8 = vunpack.c.0.s8 %v328_v4  ;;  %v346_v24 = vld [vmem:[%s800_s22 + $0x18] sm:$0xff]  ;;  %v347_v31 = vld [vmem:[%s800_s22 + $0x20] sm:$0xff]  ;;  %v348_v32 = vld [vmem:[%s800_s22 + $0x28] sm:$0xff]  ;;  %vm508_vm7 = vcmask (%p442_p6), 1040384   ;;  %vm487_vm8 = vcmask (%p442_p6), 7168   ;;  %vm522_vm9 = vcmask (%p442_p6), 0  }
  0x1e   : > { %v378_v13 = vsub.s32 0, %v808_v5  ;;  %v382_v14 = vsub.s32 1, %v808_v5  ;;  %v362_v30 = vld [vmem:[#allocation2 + $0x18] sm:$0xff]  ;;  %v363_v34 = vld [vmem:[#allocation2 + $0x20] sm:$0xff]  ;;  %v364_v35 = vld [vmem:[#allocation2 + $0x28] sm:$0xff] }
  0x1f   : > { %v332_v9 = vsub.s32 %v329_v8, %v808_v5  ;;  %v349_v36 = vld [vmem:[%s800_s22 + $0x30] sm:$0xff]  ;;  %v350_v38 = vld [vmem:[%s800_s22 + $0x38] sm:$0xff]  ;;  %v351_v40 = vld [vmem:[%s800_s22 + $0x40] sm:$0xff] }
  0x20   : > { %v434_v15 = vld [vmem:[#allocation3] sm:$0x3]  ;;  %v365_v37 = vld [vmem:[#allocation2 + $0x30] sm:$0xff]  ;;  %v366_v39 = vld [vmem:[#allocation2 + $0x38] sm:$0xff] }
  0x21   : > { %v333_v11 = vrot.slane %v326_v7, %v332_v9  ;;  %v352_v41 = vld [vmem:[%s800_s22 + $0x48] sm:$0xff]  ;;  %v367_v46 = vld [vmem:[#allocation2 + $0x40] sm:$0xff]  ;;  %v353_v48 = vld [vmem:[%s800_s22 + $0x50] sm:$0xff] }
  0x22   : > { %v368_v47 = vld [vmem:[#allocation2 + $0x48] sm:$0xff]  ;;  %v369_v49 = vld [vmem:[#allocation2 + $0x50] sm:$0xff]  ;;  %v354_v54 = vld [vmem:[%s800_s22 + $0x58] sm:$0xff] }
  0x23   : > { %v340_v12 = vrot.slane %v333_v11, %v332_v9  ;;  %v370_v55 = vld [vmem:[#allocation2 + $0x58] sm:$0xff]  ;;  %v355_v56 = vld [vmem:[%s800_s22 + $0x60] sm:$0xff]  ;;  %v356_v62 = vld [vmem:[%s800_s22 + $0x68] sm:$0xff] }
  0x24   : > { %v371_v61 = vld [vmem:[#allocation2 + $0x60] sm:$0xff]  ;;  %v372_v3 = vld [vmem:[#allocation2 + $0x68] sm:$0xff]  ;;  %v357_v4 = vld [vmem:[%s800_s22 + $0x70] sm:$0xff] }
  0x25   : > { %vm341_vm2 = vcmp.ne.s32.totalorder %v340_v12, 0  ;;  %v358_v6 = vld [vmem:[%s800_s22 + $0x78] sm:$0xff]  ;;  %v373_v11 = vld [vmem:[#allocation2 + $0x70] sm:$0xff] }
  0x26   : > { %vm342_vm3 = vmand %vm321_vm1, %vm341_vm2  ;;  %v374_v12 = vld [vmem:[#allocation2 + $0x78] sm:$0xff] }
  0x27   : > { %v375_v20 = vsel %vm342_vm3, 1, %v750_v19  ;;  %v645_v26 = vsel %vm342_vm3, 1.0, %v751_v25 }
  0x28   : > { %v824_v28 = vrot.slane %v375_v20, %v378_v13  ;;  %v828_v29 = vrot.slane %v375_v20, %v382_v14  ;;  %v436_v33 = vadd.f32 %v645_v26, %v434_v15 }
  0x2a   : > { %vm384_vm5 = vcmp.eq.s32.totalorder %v824_v28, 1  ;;  %vm385_vm6 = vcmp.eq.s32.totalorder %v828_v29, 1  ;;  %441 = vst.msk [vmem:[#allocation3] sm:$0x3] %vm818_vm4, %v436_v33 }
  0x2b   : > { %v386_v42 = vsel %vm384_vm5, %v343_v16, 0.0  ;;  %v387_v43 = vsel %vm385_vm6, %v344_v17, 0.0  ;;  %v388_v44 = vsel %vm384_vm5, %v345_v22, 0.0  ;;  %v389_v45 = vsel %vm385_vm6, %v346_v24, 0.0 }
  0x2c   : > { %v402_v50 = vadd.f32 %v386_v42, %v359_v18  ;;  %v403_v51 = vadd.f32 %v387_v43, %v360_v21  ;;  %v404_v52 = vadd.f32 %v388_v44, %v361_v23  ;;  %v405_v53 = vadd.f32 %v389_v45, %v362_v30 }
  0x2d   : > { %v390_v57 = vsel %vm384_vm5, %v347_v31, 0.0  ;;  %v391_v58 = vsel %vm385_vm6, %v348_v32, 0.0  ;;  %v392_v59 = vsel %vm384_vm5, %v349_v36, 0.0  ;;  %v393_v60 = vsel %vm385_vm6, %v350_v38, 0.0 }
  0x2e   : > { %418 = vst [vmem:[#allocation2] sm:$0xff] %v402_v50  ;;  %419 = vst [vmem:[#allocation2 + $0x8] sm:$0xff] %v403_v51  ;;  %v406_v63 = vadd.f32 %v390_v57, %v363_v34  ;;  %v407_v0 = vadd.f32 %v391_v58, %v364_v35  ;;  %v408_v1 = vadd.f32 %v392_v59, %v365_v37  ;;  %v394_v7 = vsel %vm384_vm5, %v351_v40, 0.0 }
  0x2f   : > { %420 = vst [vmem:[#allocation2 + $0x10] sm:$0xff] %v404_v52  ;;  %421 = vst [vmem:[#allocation2 + $0x18] sm:$0xff] %v405_v53  ;;  %v409_v2 = vadd.f32 %v393_v60, %v366_v39  ;;  %v395_v8 = vsel %vm385_vm6, %v352_v41, 0.0  ;;  %v396_v9 = vsel %vm384_vm5, %v353_v48, 0.0  ;;  %v397_v10 = vsel %vm385_vm6, %v354_v54, 0.0  ;;  %446 = sbr.rel (!%p442_p6) target bundleno = 262 (0x106), region = 36 }
  0x30   : > { %422 = vst [vmem:[#allocation2 + $0x20] sm:$0xff] %v406_v63  ;;  %423 = vst [vmem:[#allocation2 + $0x28] sm:$0xff] %v407_v0  ;;  %v410_v15 = vadd.f32 %v394_v7, %v367_v46  ;;  %v411_v16 = vadd.f32 %v395_v8, %v368_v47  ;;  %v412_v17 = vadd.f32 %v396_v9, %v369_v49  ;;  %v398_v19 = vsel %vm384_vm5, %v355_v56, 0.0 }
  0x31   : > { %424 = vst [vmem:[#allocation2 + $0x30] sm:$0xff] %v408_v1  ;;  %425 = vst [vmem:[#allocation2 + $0x38] sm:$0xff] %v409_v2  ;;  %v413_v18 = vadd.f32 %v397_v10, %v370_v55  ;;  %v399_v20 = vsel %vm385_vm6, %v356_v62, 0.0  ;;  %v400_v21 = vsel %vm384_vm5, %v357_v4, 0.0  ;;  %v401_v22 = vsel %vm385_vm6, %v358_v6, 0.0 }
  0x32   : > { %426 = vst [vmem:[#allocation2 + $0x40] sm:$0xff] %v410_v15  ;;  %427 = vst [vmem:[#allocation2 + $0x48] sm:$0xff] %v411_v16  ;;  %v414_v23 = vadd.f32 %v398_v19, %v371_v61  ;;  %v415_v24 = vadd.f32 %v399_v20, %v372_v3  ;;  %v416_v25 = vadd.f32 %v400_v21, %v373_v11  ;;  %v496_v27 = vld [vmem:[#allocation3] sm:$0x3] (%p442_p6) }
  0x33   : > { %428 = vst [vmem:[#allocation2 + $0x50] sm:$0xff] %v412_v17  ;;  %429 = vst [vmem:[#allocation2 + $0x58] sm:$0xff] %v413_v18  ;;  %v417_v26 = vadd.f32 %v401_v22, %v374_v12  ;;  %v501_v30 = vrot.slane (%p442_p6), %v496_v27, %v378_v13  ;;  %v505_v31 = vrot.slane (%p442_p6), %v496_v27, %v382_v14 }
  0x34   : > { %430 = vst [vmem:[#allocation2 + $0x60] sm:$0xff] %v414_v23  ;;  %431 = vst [vmem:[#allocation2 + $0x68] sm:$0xff] %v415_v24 }
  0x35   : > { %432 = vst [vmem:[#allocation2 + $0x70] sm:$0xff] %v416_v25  ;;  %433 = vst [vmem:[#allocation2 + $0x78] sm:$0xff] %v417_v26  ;;  %v509_v35 = vsel (%p442_p6), %vm508_vm7, %v501_v30, 0.0  ;;  %v510_v36 = vsel (%p442_p6), %vm508_vm7, %v505_v31, 0.0  ;;  %v447_v37 = vld [vmem:[#allocation2] sm:$0xff] (%p442_p6)  ;;  %v448_v38 = vld [vmem:[#allocation2 + $0x8] sm:$0xff] (%p442_p6) }
  0x36   : > { %v449_v28 = vld [vmem:[#allocation2 + $0x10] sm:$0xff]  ;;  %v450_v29 = vld [vmem:[#allocation2 + $0x18] sm:$0xff]  ;;  %v511_v40 = vadd.f32 %v510_v36, %v509_v35  ;;  %v463_v43 = vadd.f32 %v448_v38, %v447_v37 }
  0x37   : > { %v466_v32 = vadd.f32 %v450_v29, %v449_v28  ;;  %v451_v33 = vld [vmem:[#allocation2 + $0x20] sm:$0xff]  ;;  %v452_v34 = vld [vmem:[#allocation2 + $0x28] sm:$0xff] }
  0x38   : > { %v469_v39 = vadd.f32 %v452_v34, %v451_v33  ;;  %512 = vadd.xlane.f32.xlu0 %v511_v40  ;;  %v453_v44 = vld [vmem:[#allocation2 + $0x30] sm:$0xff]  ;;  %v454_v13 = vld [vmem:[#allocation2 + $0x38] sm:$0xff] }
  0x39   : > { %467 = vadd.xlane.f32.xlu1 %v466_v32  ;;  %v455_v41 = vld [vmem:[#allocation2 + $0x40] sm:$0xff]  ;;  %v456_v42 = vld [vmem:[#allocation2 + $0x48] sm:$0xff]  ;;  %v472_v46 = vadd.f32 %v454_v13, %v453_v44 }
  0x3a   : > { %v475_v45 = vadd.f32 %v456_v42, %v455_v41  ;;  %v457_v47 = vld [vmem:[#allocation2 + $0x50] sm:$0xff]  ;;  %v458_v48 = vld [vmem:[#allocation2 + $0x58] sm:$0xff] }
  0x3b   : > { %v459_v5 = vld [vmem:[#allocation2 + $0x60] sm:$0xff]  ;;  %v460_v14 = vld [vmem:[#allocation2 + $0x68] sm:$0xff]  ;;  %v478_v50 = vadd.f32 %v458_v48, %v457_v47 }
  0x3c   : > { %464 = vadd.xlane.f32.xlu0 %v463_v43  ;;  %v481_v49 = vadd.f32 %v460_v14, %v459_v5  ;;  %v461_v51 = vld [vmem:[#allocation2 + $0x70] sm:$0xff]  ;;  %v462_v52 = vld [vmem:[#allocation2 + $0x78] sm:$0xff] }
  0x3d   : > { %470 = vadd.xlane.f32.xlu1 %v469_v39  ;;  %v484_v53 = vadd.f32 %v462_v52, %v461_v51 }
  0x40   : > { %473 = vadd.xlane.f32.xlu0 %v472_v46 }
  0x41   : > { %476 = vadd.xlane.f32.xlu1 %v475_v45 }
  0x44   : > { %479 = vadd.xlane.f32.xlu0 %v478_v50 }
  0x45   : > { %482 = vadd.xlane.f32.xlu1 %v481_v49 }
  0x48   : > { %485 = vadd.xlane.f32.xlu0 %v484_v53 }
  0xc5   : > { %v513_v55 = vpop.xlane.xlu0 %512 }
  0xc6   : > { %v468_v54 = vpop.xlane.xlu1 %467  ;;  %v514_v56 = vrot.slane %v513_v55, 4 }
  0xc7   : > { %489 = vst.msk [vmem:[%s955_s2 + $0x8] sm:$0xff] %vm487_vm8, %v468_v54 }
  0xc8   : > { %v515_v58 = vadd.f32 %v514_v56, %v513_v55 }
  0xc9   : > { %v465_v59 = vpop.xlane.xlu0 %464 }
  0xca   : > { %v471_v57 = vpop.xlane.xlu1 %470  ;;  %v516_v60 = vrot.slane %v515_v58, 2  ;;  %488 = vst.msk [vmem:[%s955_s2] sm:$0xff] %vm487_vm8, %v465_v59 }
  0xcb   : > { %490 = vst.msk [vmem:[%s955_s2 + $0x10] sm:$0xff] %vm487_vm8, %v471_v57 }
  0xcc   : > { %v517_v62 = vadd.f32 %v516_v60, %v515_v58 }
  0xcd   : > { %v474_v63 = vpop.xlane.xlu0 %473 }
  0xce   : > { %v477_v61 = vpop.xlane.xlu1 %476  ;;  %v518_v0 = vrot.slane %v517_v62, 1  ;;  %491 = vst.msk [vmem:[%s955_s2 + $0x18] sm:$0xff] %vm487_vm8, %v474_v63 }
  0xcf   : > { %492 = vst.msk [vmem:[%s955_s2 + $0x20] sm:$0xff] %vm487_vm8, %v477_v61 }
  0xd0   : > { %v519_v2 = vadd.f32 %v518_v0, %v517_v62 }
  0xd1   : > { %v480_v3 = vpop.xlane.xlu0 %479 }
  0xd2   : > { %v483_v1 = vpop.xlane.xlu1 %482  ;;  %655 = vpush %v519_v2 }
  0xd3   : > { %494 = vst.msk [vmem:[%s955_s2 + $0x30] sm:$0xff] %vm487_vm8, %v483_v1  ;;  %493 = vst.msk [vmem:[%s955_s2 + $0x28] sm:$0xff] %vm487_vm8, %v480_v3 }
  0xd5   : > { %v486_v4 = vpop.xlane.xlu0 %485 }
  0xd6   : > { %495 = vst.msk [vmem:[%s955_s2 + $0x38] sm:$0xff] %vm487_vm8, %v486_v4 }
 0x103   : > { %s656_s19 = spop %655 }
 0x104   : > { %v521_v6 = vstv %s656_s19 }
 0x105   : > { %523 = vst.msk [vmem:[#allocation4] sm:$0x1] %vm522_vm9, %v521_v6 }
 0x106 PF: > { %p918_p7 = scmp.eq.s32.totalorder %s637_s15, 1  ;;  %s752_s21 = smov [#allocation4]  }
 0x107   : > { %s541_s22 = sshll.u32 %s752_s21, 4  ;;  %s542_s22 = int_to_ptr.vmem [resolvable:$true] %s541_s22 }
 0x108   : > { %s693_s23 = scalar_lea.vmem %s542_s22, 16  ;;  %s699_s24 = scalar_lea.vmem %s542_s22, 32 }
 0x109   : > { %p694_p8 = scmp.ne.s32.totalorder %s542_s22, %s693_s23  ;;  %p700_p11 = scmp.lt.s32.totalorder %s542_s22, %s542_s22 }
 0x10a   : > { %p701_p12 = scmp.lt.s32.totalorder %s699_s24, %s693_s23 }
 0x10b   : > { %p695_p9 = pnand %p694_p8, %p918_p7 }
 0x10c   : > { %p702_p13 = por %p701_p12, %p700_p11 }
 0x10d   : > { %p696_p10 = pneg %p695_p9 }
 0x10f   : > { %p703_p0 = pnand %p702_p13, %p696_p10 }
 0x111   : > { %706 = shalt.err (!%p703_p0)
}
 0x112   : > { %s707_s26 = scalar_lea.hbm %s956_s3, 16 }
 0x113   : > { %p708_p1 = scmp.ne.s32.totalorder %s956_s3, %s707_s26  ;;  %p713_p4 = scmp.lt.u32.totalorder %s707_s26, %s956_s3 }
 0x115   : > { %p709_p2 = pnand %p708_p1, %p918_p7 }
 0x117   : > { %p710_p3 = pneg %p709_p2 }
 0x119   : > { %p715_p5 = pnand %p713_p4, %p710_p3 }
 0x11b   : > { %718 = shalt.err (!%p715_p5)
}
 0x11c   : > { %658 = dma.vmem_to_hbm [thread:$0]  (%p918_p7), %s542_s22, 16, %s956_s3, [#allocation5]  }
 0x11d   : > { %732 = dma.done.wait (%p918_p7), [#allocation5], 16  }
 0x11e   : > { %734 = vsyncadd (%p918_p7), [#allocation5], 4294967280 }
 0x11f PF: > { %s15_s14 = sadd.s32 1, %s745_s14   ;;  %s960_s12 = smov %s741_s13 }
 0x120   : > { %p12_p6 = scmp.ge.s32.totalorder %s15_s14, 4   ;;  %s961_s13 = smov %s963_s16 }
 0x122   :  { %14 = sbr.rel (!%p12_p6) target bundleno = 2 (0x2), region = 79 }
 0x129   :  { %562 = vsyncpa [#allocation5], 1 }
 0x12a   :  { %564 = vsyncpa [#allocation5 + $0x1], 1 }

</bundles_post_ra>
